<compile_context>
chip_gen: v7x
topology: tpu7x:2x2x1
jax: 0.10.0
libtpu: 0.0.40
codegen_flags: <defaults>
</compile_context>

<pallas_src>
import functools

import jax
import jax.numpy as jnp
from jax import lax
from jax.experimental import pallas as pl
from jax.experimental.pallas import tpu as pltpu


def _init_layer_kernel(x_ref, w_ref, bias_ref, beta_ref, gsel_ref, gbc_ref,
                       gbcg_ref, out_ref, *, inv_group_size, eps):
    # x_ref:    (Bt, nz)      latent rows
    # w_ref:    (2, nz, Lh)   spectrally-normalized deconv weight, GLU halves stacked
    # bias_ref: (2, 1, Lh)    conv bias per lane, per half
    # beta_ref: (2, 1, Lh)    GroupNorm shift per lane, per half
    # gsel_ref: (2, Lh, G)    0/1 group-membership selector, per half
    # gbc_ref:  (2, G, Lh)    group -> lane broadcast (transpose of gsel), per half
    # gbcg_ref: (2, G, Lh)    gbc scaled by GroupNorm gamma per lane, per half
    # out_ref:  (Bt, Lh)      GLU output lanes (lane = channel*9 + spatial)
    hi = lax.Precision.HIGHEST
    x = x_ref[...]

    # Transposed conv on a 1x1 latent == matmul; compute both GLU halves directly.
    y_a = jnp.dot(x, w_ref[0], precision=hi,
                  preferred_element_type=jnp.float32) + bias_ref[0]        # (Bt, Lh)
    y_b = jnp.dot(x, w_ref[1], precision=hi,
                  preferred_element_type=jnp.float32) + bias_ref[1]        # (Bt, Lh)

    # GroupNorm statistics via selector matmuls; per-half partial sums are added,
    # which also handles groups that straddle the GLU channel split.
    sum_g = (jnp.dot(y_a, gsel_ref[0], precision=hi, preferred_element_type=jnp.float32)
             + jnp.dot(y_b, gsel_ref[1], precision=hi, preferred_element_type=jnp.float32))
    mean_g = sum_g * inv_group_size                                        # (Bt, G)
    mean_a = jnp.dot(mean_g, gbc_ref[0], precision=hi,
                     preferred_element_type=jnp.float32)                   # (Bt, Lh)
    mean_b = jnp.dot(mean_g, gbc_ref[1], precision=hi,
                     preferred_element_type=jnp.float32)                   # (Bt, Lh)
    d_a = y_a - mean_a
    d_b = y_b - mean_b
    var_g = (jnp.dot(d_a * d_a, gsel_ref[0], precision=hi,
                     preferred_element_type=jnp.float32)
             + jnp.dot(d_b * d_b, gsel_ref[1], precision=hi,
                       preferred_element_type=jnp.float32)) * inv_group_size
    rstd_g = lax.rsqrt(var_g + eps)                                        # (Bt, G)

    # gamma is folded into the broadcast matrices (gbcg = gbc * gamma[lane]).
    scale_a = jnp.dot(rstd_g, gbcg_ref[0], precision=hi,
                      preferred_element_type=jnp.float32)                  # (Bt, Lh)
    scale_b = jnp.dot(rstd_g, gbcg_ref[1], precision=hi,
                      preferred_element_type=jnp.float32)                  # (Bt, Lh)
    yn_a = d_a * scale_a + beta_ref[0]
    yn_b = d_b * scale_b + beta_ref[1]

    # GLU along channels: out = a * sigmoid(b)
    out_ref[...] = (yn_a * (1.0 / (1.0 + jnp.exp(-yn_b)))).astype(out_ref.dtype)


def _spectral_sigma(w_mat, n_iter=30):
    """Largest singular value of w_mat via power iteration (deterministic start)."""
    # TODO(synk): PyTorch's spectral_norm keeps persistent, randomly-initialized
    # (u, v) buffers and runs one power iteration per training forward; here sigma
    # is computed to convergence instead (the value the PyTorch estimate tracks).
    u = jnp.full((w_mat.shape[0],), 1.0 / jnp.sqrt(w_mat.shape[0]), w_mat.dtype)

    def body(_, u):
        v = w_mat.T @ u
        v = v / (jnp.linalg.norm(v) + 1e-12)
        u = w_mat @ v
        u = u / (jnp.linalg.norm(u) + 1e-12)
        return u

    u = lax.fori_loop(0, n_iter, body, u)
    v = w_mat.T @ u
    v = v / (jnp.linalg.norm(v) + 1e-12)
    return u @ (w_mat @ v)


def init_layer_forward(noise, params, *, eps=1e-5, interpret=False):
    """noise: (B, nz, 1, 1) or (B, nz).  Returns (B, C, 3, 3)."""
    w = params["deconv_w"]          # (nz, 2C, 3, 3) ConvTranspose2d weight
    b = params["deconv_b"]          # (2C,)
    gamma = params["gn_w"]          # (2C,)
    beta = params["gn_b"]           # (2C,)

    nz, c2, kh, kw = w.shape
    assert kh == 3 and kw == 3 and c2 % 4 == 0
    C = c2 // 2
    G = c2 // 4                     # GroupNorm(c2 // 4, c2): 4 channels / group
    K = kh * kw                     # 9 spatial positions
    Lh = C * K                      # lanes per GLU half

    if noise.ndim == 4:
        assert noise.shape[2] == 1 and noise.shape[3] == 1, (
            "InitLayer expects a 1x1 spatial latent")
        x = noise.reshape(noise.shape[0], noise.shape[1])
    else:
        x = noise
    assert x.shape[1] == nz
    B = x.shape[0]
    x = x.astype(jnp.float32)

    # --- spectral_norm(ConvTranspose2d): W / sigma (PyTorch uses dim=1) ---------
    w_mat = jnp.transpose(w, (1, 0, 2, 3)).reshape(c2, nz * K).astype(jnp.float32)
    sigma = _spectral_sigma(w_mat)
    w_sn = (w.astype(jnp.float32) / sigma).reshape(nz, c2 * K)        # (nz, 2C*9)
    w2 = jnp.stack([w_sn[:, :Lh], w_sn[:, Lh:]], axis=0)              # (2, nz, Lh)

    # --- per-lane constants (lane = channel*9 + spatial), split per GLU half ----
    bias_l = jnp.repeat(b.astype(jnp.float32), K)                     # (2C*9,)
    gamma_l = jnp.repeat(gamma.astype(jnp.float32), K)
    beta_l = jnp.repeat(beta.astype(jnp.float32), K)
    bias2 = jnp.stack([bias_l[:Lh], bias_l[Lh:]], axis=0)[:, None, :]   # (2, 1, Lh)
    beta2 = jnp.stack([beta_l[:Lh], beta_l[Lh:]], axis=0)[:, None, :]   # (2, 1, Lh)

    ch_a = jnp.arange(Lh) // K                        # channel of each half-a lane
    grp_a = ch_a // (c2 // G)                         # its GroupNorm group
    grp_b = (ch_a + C) // (c2 // G)                   # group of the half-b lane
    gids = jnp.arange(G)[None, :]
    gsel_a = (grp_a[:, None] == gids).astype(jnp.float32)             # (Lh, G)
    gsel_b = (grp_b[:, None] == gids).astype(jnp.float32)             # (Lh, G)
    gsel2 = jnp.stack([gsel_a, gsel_b], axis=0)                       # (2, Lh, G)
    gbc2 = jnp.stack([gsel_a.T, gsel_b.T], axis=0)                    # (2, G, Lh)
    gbcg2 = jnp.stack([gsel_a.T * gamma_l[None, :Lh],
                       gsel_b.T * gamma_l[None, Lh:]], axis=0)        # (2, G, Lh)

    # --- batch tiling: one fat block for small B, 512-row blocks otherwise ------
    if B <= 512:
        Bt, B_pad = B, B
    else:
        Bt = 512                                                      # multiple of 8
        B_pad = ((B + Bt - 1) // Bt) * Bt
    if B_pad != B:
        x = jnp.concatenate([x, jnp.zeros((B_pad - B, nz), x.dtype)], axis=0)
    nb = B_pad // Bt

    kernel = functools.partial(
        _init_layer_kernel,
        inv_group_size=1.0 / float((c2 // G) * K),
        eps=float(eps))

    out = pl.pallas_call(
        kernel,
        out_shape=jax.ShapeDtypeStruct((B_pad, Lh), jnp.float32),
        grid_spec=pltpu.PrefetchScalarGridSpec(
            num_scalar_prefetch=0,
            grid=(nb,),
            in_specs=[
                pl.BlockSpec((Bt, nz), lambda i: (i, 0)),        # latent rows
                pl.BlockSpec((2, nz, Lh), lambda i: (0, 0, 0)),  # deconv weight halves
                pl.BlockSpec((2, 1, Lh), lambda i: (0, 0, 0)),   # bias per lane
                pl.BlockSpec((2, 1, Lh), lambda i: (0, 0, 0)),   # GN beta per lane
                pl.BlockSpec((2, Lh, G), lambda i: (0, 0, 0)),   # group selector
                pl.BlockSpec((2, G, Lh), lambda i: (0, 0, 0)),   # group broadcast
                pl.BlockSpec((2, G, Lh), lambda i: (0, 0, 0)),   # gamma-scaled broadcast
            ],
            out_specs=pl.BlockSpec((Bt, Lh), lambda i: (i, 0)),
        ),
        compiler_params=pltpu.CompilerParams(
            dimension_semantics=("parallel",),
        ),
        interpret=interpret,
    )(x, w2, bias2, beta2, gsel2, gbc2, gbcg2)

    return out[:B].reshape(B, C, kh, kw)


def init_layer_reference(noise, params, eps=1e-5):
    """Plain-JAX reference of InitLayer.forward (same spectral-norm sigma)."""
    w = params["deconv_w"]
    b = params["deconv_b"]
    gamma = params["gn_w"]
    beta = params["gn_b"]
    nz, c2, kh, kw = w.shape
    C, G = c2 // 2, c2 // 4
    x = noise.reshape(noise.shape[0], nz).astype(jnp.float32)
    w_mat = jnp.transpose(w, (1, 0, 2, 3)).reshape(c2, -1).astype(jnp.float32)
    w_sn = w.astype(jnp.float32) / _spectral_sigma(w_mat)
    y = jnp.einsum("bn,ncij->bcij", x, w_sn,
                   precision=jax.lax.Precision.HIGHEST) + b[None, :, None, None]
    B = y.shape[0]
    yg = y.reshape(B, G, -1)
    mean = yg.mean(-1, keepdims=True)
    var = ((yg - mean) ** 2).mean(-1, keepdims=True)
    yn = (yg - mean) * lax.rsqrt(var + eps)
    yn = yn.reshape(B, c2, kh, kw) * gamma[None, :, None, None] + beta[None, :, None, None]
    a, g = yn[:, :C], yn[:, C:]
    return a * (1.0 / (1.0 + jnp.exp(-g)))


if __name__ == "__main__":
    key = jax.random.PRNGKey(0)
    k_noise, k_w, k_b = jax.random.split(key, 3)

    B, nz, channel = 2, 32, 4            # small demo shapes (hidden=32, channels=4)
    c2 = channel * 2

    noise = jax.random.normal(k_noise, (B, nz, 1, 1), dtype=jnp.float32)
    params = {
        "deconv_w": jax.random.normal(k_w, (nz, c2, 3, 3), dtype=jnp.float32) * 0.1,
        "deconv_b": jax.random.normal(k_b, (c2,), dtype=jnp.float32) * 0.1,
        # GroupNorm affine params (PyTorch init is weight=1, bias=0); perturbed so
        # the affine path is actually exercised.
        "gn_w": 1.0 + 0.05 * jnp.arange(c2, dtype=jnp.float32),
        "gn_b": 0.01 * jnp.arange(c2, dtype=jnp.float32),
    }

    out = init_layer_forward(noise, params)
    out = jax.block_until_ready(out)

    ref = init_layer_reference(noise, params)
    assert out.shape == (B, channel, 3, 3)
    err = float(jnp.max(jnp.abs(out - ref)))
    assert jnp.allclose(out, ref, atol=1e-4, rtol=1e-4), err

    print("KERNEL_OK")
</pallas_src>

<mosaic_0001>
module attributes {stable_mosaic.version = 11 : i64} {
  func.func @_init_layer_kernel(%arg0: i32, %arg1: memref<2x32xf32, #tpu.memory_space<vmem>>, %arg2: memref<2x32x36xf32, #tpu.memory_space<vmem>>, %arg3: memref<2x1x36xf32, #tpu.memory_space<vmem>>, %arg4: memref<2x1x36xf32, #tpu.memory_space<vmem>>, %arg5: memref<2x36x2xf32, #tpu.memory_space<vmem>>, %arg6: memref<2x2x36xf32, #tpu.memory_space<vmem>>, %arg7: memref<2x2x36xf32, #tpu.memory_space<vmem>>, %arg8: memref<2x36xf32, #tpu.memory_space<vmem>>) attributes {dimension_semantics = [#tpu.dimension_semantics<parallel>], iteration_bounds = array<i64: 1>, scalar_prefetch = 0 : i64, scratch_operands = 0 : i64, tpu.core_type = #tpu.core_type<tc>, window_params = [{transform_indices = @transform_0, window_bounds = array<i64: 2, 32>}, {pipeline_mode = #tpu.pipeline_mode<synchronous>, transform_indices = @transform_1, window_bounds = array<i64: 2, 32, 36>}, {pipeline_mode = #tpu.pipeline_mode<synchronous>, transform_indices = @transform_2, window_bounds = array<i64: 2, 1, 36>}, {pipeline_mode = #tpu.pipeline_mode<synchronous>, transform_indices = @transform_3, window_bounds = array<i64: 2, 1, 36>}, {pipeline_mode = #tpu.pipeline_mode<synchronous>, transform_indices = @transform_4, window_bounds = array<i64: 2, 36, 2>}, {pipeline_mode = #tpu.pipeline_mode<synchronous>, transform_indices = @transform_5, window_bounds = array<i64: 2, 2, 36>}, {pipeline_mode = #tpu.pipeline_mode<synchronous>, transform_indices = @transform_6, window_bounds = array<i64: 2, 2, 36>}, {transform_indices = @transform_7, window_bounds = array<i64: 2, 36>}]} {
    %c0 = arith.constant 0 : index
    %c0_0 = arith.constant 0 : index
    %0 = vector.load %arg1[%c0, %c0_0] : memref<2x32xf32, #tpu.memory_space<vmem>>, vector<2x32xf32>
    %c0_1 = arith.constant 0 : index
    %c0_2 = arith.constant 0 : index
    %c0_3 = arith.constant 0 : index
    %1 = vector.load %arg2[%c0_1, %c0_2, %c0_3] : memref<2x32x36xf32, #tpu.memory_space<vmem>>, vector<1x32x36xf32>
    %2 = vector.shape_cast %1 : vector<1x32x36xf32> to vector<32x36xf32>
    %cst = arith.constant dense<0.000000e+00> : vector<2x36xf32>
    %3 = tpu.matmul %0, %2, %cst {dimension_numbers = #tpu.dot_dimension_numbers<[1], [0], [0], [1], [0, 0, 1, 1], [], []>, precision = #tpu.contract_precision<fp32>} : vector<2x32xf32>, vector<32x36xf32>, vector<2x36xf32> -> vector<2x36xf32>
    %c0_4 = arith.constant 0 : index
    %c0_5 = arith.constant 0 : index
    %c0_6 = arith.constant 0 : index
    %4 = vector.load %arg3[%c0_4, %c0_5, %c0_6] : memref<2x1x36xf32, #tpu.memory_space<vmem>>, vector<1x1x36xf32>
    %5 = vector.shape_cast %4 : vector<1x1x36xf32> to vector<1x36xf32>
    %6 = vector.broadcast %5 : vector<1x36xf32> to vector<2x36xf32>
    %7 = arith.addf %3, %6 : vector<2x36xf32>
    %c1 = arith.constant 1 : index
    %c0_7 = arith.constant 0 : index
    %c0_8 = arith.constant 0 : index
    %8 = vector.load %arg2[%c1, %c0_7, %c0_8] : memref<2x32x36xf32, #tpu.memory_space<vmem>>, vector<1x32x36xf32>
    %9 = vector.shape_cast %8 : vector<1x32x36xf32> to vector<32x36xf32>
    %cst_9 = arith.constant dense<0.000000e+00> : vector<2x36xf32>
    %10 = tpu.matmul %0, %9, %cst_9 {dimension_numbers = #tpu.dot_dimension_numbers<[1], [0], [0], [1], [0, 0, 1, 1], [], []>, precision = #tpu.contract_precision<fp32>} : vector<2x32xf32>, vector<32x36xf32>, vector<2x36xf32> -> vector<2x36xf32>
    %c1_10 = arith.constant 1 : index
    %c0_11 = arith.constant 0 : index
    %c0_12 = arith.constant 0 : index
    %11 = vector.load %arg3[%c1_10, %c0_11, %c0_12] : memref<2x1x36xf32, #tpu.memory_space<vmem>>, vector<1x1x36xf32>
    %12 = vector.shape_cast %11 : vector<1x1x36xf32> to vector<1x36xf32>
    %13 = vector.broadcast %12 : vector<1x36xf32> to vector<2x36xf32>
    %14 = arith.addf %10, %13 : vector<2x36xf32>
    %c0_13 = arith.constant 0 : index
    %c0_14 = arith.constant 0 : index
    %c0_15 = arith.constant 0 : index
    %15 = vector.load %arg5[%c0_13, %c0_14, %c0_15] : memref<2x36x2xf32, #tpu.memory_space<vmem>>, vector<1x36x2xf32>
    %16 = vector.shape_cast %15 : vector<1x36x2xf32> to vector<36x2xf32>
    %cst_16 = arith.constant dense<0.000000e+00> : vector<2x2xf32>
    %17 = tpu.matmul %7, %16, %cst_16 {dimension_numbers = #tpu.dot_dimension_numbers<[1], [0], [0], [1], [0, 0, 1, 1], [], []>, precision = #tpu.contract_precision<fp32>} : vector<2x36xf32>, vector<36x2xf32>, vector<2x2xf32> -> vector<2x2xf32>
    %c1_17 = arith.constant 1 : index
    %c0_18 = arith.constant 0 : index
    %c0_19 = arith.constant 0 : index
    %18 = vector.load %arg5[%c1_17, %c0_18, %c0_19] : memref<2x36x2xf32, #tpu.memory_space<vmem>>, vector<1x36x2xf32>
    %19 = vector.shape_cast %18 : vector<1x36x2xf32> to vector<36x2xf32>
    %cst_20 = arith.constant dense<0.000000e+00> : vector<2x2xf32>
    %20 = tpu.matmul %14, %19, %cst_20 {dimension_numbers = #tpu.dot_dimension_numbers<[1], [0], [0], [1], [0, 0, 1, 1], [], []>, precision = #tpu.contract_precision<fp32>} : vector<2x36xf32>, vector<36x2xf32>, vector<2x2xf32> -> vector<2x2xf32>
    %21 = arith.addf %17, %20 : vector<2x2xf32>
    %cst_21 = arith.constant 0.027777778 : f32
    %22 = vector.broadcast %cst_21 : f32 to vector<2x2xf32>
    %23 = arith.mulf %21, %22 : vector<2x2xf32>
    %c0_22 = arith.constant 0 : index
    %c0_23 = arith.constant 0 : index
    %c0_24 = arith.constant 0 : index
    %24 = vector.load %arg6[%c0_22, %c0_23, %c0_24] : memref<2x2x36xf32, #tpu.memory_space<vmem>>, vector<1x2x36xf32>
    %25 = vector.shape_cast %24 : vector<1x2x36xf32> to vector<2x36xf32>
    %cst_25 = arith.constant dense<0.000000e+00> : vector<2x36xf32>
    %26 = tpu.matmul %23, %25, %cst_25 {dimension_numbers = #tpu.dot_dimension_numbers<[1], [0], [0], [1], [0, 0, 1, 1], [], []>, precision = #tpu.contract_precision<fp32>} : vector<2x2xf32>, vector<2x36xf32>, vector<2x36xf32> -> vector<2x36xf32>
    %c1_26 = arith.constant 1 : index
    %c0_27 = arith.constant 0 : index
    %c0_28 = arith.constant 0 : index
    %27 = vector.load %arg6[%c1_26, %c0_27, %c0_28] : memref<2x2x36xf32, #tpu.memory_space<vmem>>, vector<1x2x36xf32>
    %28 = vector.shape_cast %27 : vector<1x2x36xf32> to vector<2x36xf32>
    %cst_29 = arith.constant dense<0.000000e+00> : vector<2x36xf32>
    %29 = tpu.matmul %23, %28, %cst_29 {dimension_numbers = #tpu.dot_dimension_numbers<[1], [0], [0], [1], [0, 0, 1, 1], [], []>, precision = #tpu.contract_precision<fp32>} : vector<2x2xf32>, vector<2x36xf32>, vector<2x36xf32> -> vector<2x36xf32>
    %30 = arith.subf %7, %26 : vector<2x36xf32>
    %31 = arith.subf %14, %29 : vector<2x36xf32>
    %32 = arith.mulf %30, %30 : vector<2x36xf32>
    %c0_30 = arith.constant 0 : index
    %c0_31 = arith.constant 0 : index
    %c0_32 = arith.constant 0 : index
    %33 = vector.load %arg5[%c0_30, %c0_31, %c0_32] : memref<2x36x2xf32, #tpu.memory_space<vmem>>, vector<1x36x2xf32>
    %34 = vector.shape_cast %33 : vector<1x36x2xf32> to vector<36x2xf32>
    %cst_33 = arith.constant dense<0.000000e+00> : vector<2x2xf32>
    %35 = tpu.matmul %32, %34, %cst_33 {dimension_numbers = #tpu.dot_dimension_numbers<[1], [0], [0], [1], [0, 0, 1, 1], [], []>, precision = #tpu.contract_precision<fp32>} : vector<2x36xf32>, vector<36x2xf32>, vector<2x2xf32> -> vector<2x2xf32>
    %36 = arith.mulf %31, %31 : vector<2x36xf32>
    %c1_34 = arith.constant 1 : index
    %c0_35 = arith.constant 0 : index
    %c0_36 = arith.constant 0 : index
    %37 = vector.load %arg5[%c1_34, %c0_35, %c0_36] : memref<2x36x2xf32, #tpu.memory_space<vmem>>, vector<1x36x2xf32>
    %38 = vector.shape_cast %37 : vector<1x36x2xf32> to vector<36x2xf32>
    %cst_37 = arith.constant dense<0.000000e+00> : vector<2x2xf32>
    %39 = tpu.matmul %36, %38, %cst_37 {dimension_numbers = #tpu.dot_dimension_numbers<[1], [0], [0], [1], [0, 0, 1, 1], [], []>, precision = #tpu.contract_precision<fp32>} : vector<2x36xf32>, vector<36x2xf32>, vector<2x2xf32> -> vector<2x2xf32>
    %40 = arith.addf %35, %39 : vector<2x2xf32>
    %cst_38 = arith.constant 0.027777778 : f32
    %41 = vector.broadcast %cst_38 : f32 to vector<2x2xf32>
    %42 = arith.mulf %40, %41 : vector<2x2xf32>
    %cst_39 = arith.constant 9.99999974E-6 : f32
    %43 = vector.broadcast %cst_39 : f32 to vector<2x2xf32>
    %44 = arith.addf %42, %43 : vector<2x2xf32>
    %45 = math.rsqrt %44 : vector<2x2xf32>
    %c0_40 = arith.constant 0 : index
    %c0_41 = arith.constant 0 : index
    %c0_42 = arith.constant 0 : index
    %46 = vector.load %arg7[%c0_40, %c0_41, %c0_42] : memref<2x2x36xf32, #tpu.memory_space<vmem>>, vector<1x2x36xf32>
    %47 = vector.shape_cast %46 : vector<1x2x36xf32> to vector<2x36xf32>
    %cst_43 = arith.constant dense<0.000000e+00> : vector<2x36xf32>
    %48 = tpu.matmul %45, %47, %cst_43 {dimension_numbers = #tpu.dot_dimension_numbers<[1], [0], [0], [1], [0, 0, 1, 1], [], []>, precision = #tpu.contract_precision<fp32>} : vector<2x2xf32>, vector<2x36xf32>, vector<2x36xf32> -> vector<2x36xf32>
    %c1_44 = arith.constant 1 : index
    %c0_45 = arith.constant 0 : index
    %c0_46 = arith.constant 0 : index
    %49 = vector.load %arg7[%c1_44, %c0_45, %c0_46] : memref<2x2x36xf32, #tpu.memory_space<vmem>>, vector<1x2x36xf32>
    %50 = vector.shape_cast %49 : vector<1x2x36xf32> to vector<2x36xf32>
    %cst_47 = arith.constant dense<0.000000e+00> : vector<2x36xf32>
    %51 = tpu.matmul %45, %50, %cst_47 {dimension_numbers = #tpu.dot_dimension_numbers<[1], [0], [0], [1], [0, 0, 1, 1], [], []>, precision = #tpu.contract_precision<fp32>} : vector<2x2xf32>, vector<2x36xf32>, vector<2x36xf32> -> vector<2x36xf32>
    %52 = arith.mulf %30, %48 : vector<2x36xf32>
    %c0_48 = arith.constant 0 : index
    %c0_49 = arith.constant 0 : index
    %c0_50 = arith.constant 0 : index
    %53 = vector.load %arg4[%c0_48, %c0_49, %c0_50] : memref<2x1x36xf32, #tpu.memory_space<vmem>>, vector<1x1x36xf32>
    %54 = vector.shape_cast %53 : vector<1x1x36xf32> to vector<1x36xf32>
    %55 = vector.broadcast %54 : vector<1x36xf32> to vector<2x36xf32>
    %56 = arith.addf %52, %55 : vector<2x36xf32>
    %57 = arith.mulf %31, %51 : vector<2x36xf32>
    %c1_51 = arith.constant 1 : index
    %c0_52 = arith.constant 0 : index
    %c0_53 = arith.constant 0 : index
    %58 = vector.load %arg4[%c1_51, %c0_52, %c0_53] : memref<2x1x36xf32, #tpu.memory_space<vmem>>, vector<1x1x36xf32>
    %59 = vector.shape_cast %58 : vector<1x1x36xf32> to vector<1x36xf32>
    %60 = vector.broadcast %59 : vector<1x36xf32> to vector<2x36xf32>
    %61 = arith.addf %57, %60 : vector<2x36xf32>
    %cst_54 = arith.constant 0.000000e+00 : f32
    %62 = vector.broadcast %cst_54 : f32 to vector<2x36xf32>
    %63 = arith.subf %62, %61 : vector<2x36xf32>
    %64 = math.exp %63 : vector<2x36xf32>
    %cst_55 = arith.constant 1.000000e+00 : f32
    %65 = vector.broadcast %cst_55 : f32 to vector<2x36xf32>
    %66 = arith.addf %65, %64 : vector<2x36xf32>
    %cst_56 = arith.constant 1.000000e+00 : f32
    %67 = vector.broadcast %cst_56 : f32 to vector<2x36xf32>
    %68 = arith.divf %67, %66 : vector<2x36xf32>
    %69 = arith.mulf %56, %68 : vector<2x36xf32>
    %c0_57 = arith.constant 0 : index
    %c0_58 = arith.constant 0 : index
    %70 = vector.load %arg8[%c0_57, %c0_58] : memref<2x36xf32, #tpu.memory_space<vmem>>, vector<2x36xf32>
    tpu.vector_store %arg8[%c0_57, %c0_58], %69 {strides = array<i32>} : memref<2x36xf32, #tpu.memory_space<vmem>>, vector<2x36xf32>,
    return
  }
  func.func @transform_0(%arg0: i32) -> (i32, i32) {
    %c0_i32 = arith.constant 0 : i32
    %c0_i32_0 = arith.constant 0 : i32
    return %arg0, %c0_i32 : i32, i32
  }
  func.func @transform_1(%arg0: i32) -> (i32, i32, i32) {
    %c0_i32 = arith.constant 0 : i32
    %c0_i32_0 = arith.constant 0 : i32
    %c0_i32_1 = arith.constant 0 : i32
    %c0_i32_2 = arith.constant 0 : i32
    return %c0_i32, %c0_i32_0, %c0_i32_1 : i32, i32, i32
  }
  func.func @transform_2(%arg0: i32) -> (i32, i32, i32) {
    %c0_i32 = arith.constant 0 : i32
    %c0_i32_0 = arith.constant 0 : i32
    %c0_i32_1 = arith.constant 0 : i32
    %c0_i32_2 = arith.constant 0 : i32
    return %c0_i32, %c0_i32_0, %c0_i32_1 : i32, i32, i32
  }
  func.func @transform_3(%arg0: i32) -> (i32, i32, i32) {
    %c0_i32 = arith.constant 0 : i32
    %c0_i32_0 = arith.constant 0 : i32
    %c0_i32_1 = arith.constant 0 : i32
    %c0_i32_2 = arith.constant 0 : i32
    return %c0_i32, %c0_i32_0, %c0_i32_1 : i32, i32, i32
  }
  func.func @transform_4(%arg0: i32) -> (i32, i32, i32) {
    %c0_i32 = arith.constant 0 : i32
    %c0_i32_0 = arith.constant 0 : i32
    %c0_i32_1 = arith.constant 0 : i32
    %c0_i32_2 = arith.constant 0 : i32
    return %c0_i32, %c0_i32_0, %c0_i32_1 : i32, i32, i32
  }
  func.func @transform_5(%arg0: i32) -> (i32, i32, i32) {
    %c0_i32 = arith.constant 0 : i32
    %c0_i32_0 = arith.constant 0 : i32
    %c0_i32_1 = arith.constant 0 : i32
    %c0_i32_2 = arith.constant 0 : i32
    return %c0_i32, %c0_i32_0, %c0_i32_1 : i32, i32, i32
  }
  func.func @transform_6(%arg0: i32) -> (i32, i32, i32) {
    %c0_i32 = arith.constant 0 : i32
    %c0_i32_0 = arith.constant 0 : i32
    %c0_i32_1 = arith.constant 0 : i32
    %c0_i32_2 = arith.constant 0 : i32
    return %c0_i32, %c0_i32_0, %c0_i32_1 : i32, i32, i32
  }
  func.func @transform_7(%arg0: i32) -> (i32, i32) {
    %c0_i32 = arith.constant 0 : i32
    %c0_i32_0 = arith.constant 0 : i32
    return %arg0, %c0_i32 : i32, i32
  }
}

</mosaic_0001>

<bundles_post_ra>
// kernel: tpu_custom_call.1
= control target key start
LH: loop header
LB: loop body
LE: loop exit
PB: predicated region body
PF: predicated region fallthrough
CT: control target
= control target key end

     0   :  { %v6098_v3 = vmov 0.0|0.0   ;;  %vm6099_vm0 = vmmov 0   ;;  %v6100_v8 = vmov 0.0   ;;  %vm39_vm1 = vcmask 261120   ;;  %s6769_s0 = inlined_call_operand.vmem [shape: f32[2,32], index: 0, kind: input, shape index: {}]   ;;  %s6770_s1 = inlined_call_operand.vmem [shape: f32[2,32,36], index: 1, kind: input, shape index: {}]   ;;  %s6771_s2 = inlined_call_operand.vmem [shape: f32[2,1,36], index: 2, kind: input, shape index: {}]   ;;  %s6772_s3 = inlined_call_operand.vmem [shape: f32[2,1,36], index: 3, kind: input, shape index: {}]   ;;  %s6773_s4 = inlined_call_operand.vmem [shape: f32[2,36,2], index: 4, kind: input, shape index: {}]   ;;  %s6774_s5 = inlined_call_operand.vmem [shape: f32[2,2,36], index: 5, kind: input, shape index: {}]   ;;  %s6775_s6 = inlined_call_operand.vmem [shape: f32[2,2,36], index: 6, kind: input, shape index: {}]   ;;  %s6776_s7 = inlined_call_operand.hbm [shape: f32[2,36], index: 7, kind: output, shape index: {}]  }
   0x1   :  { %v4910_v0 = vld [vmem:[%s6770_s1 + $0x20] sm:$0xff]  ;;  %v4911_v1 = vld [vmem:[%s6770_s1 + $0x28] sm:$0xff]  ;;  %v4912_v2 = vld [vmem:[%s6770_s1 + $0x30] sm:$0xff]  ;;  %5778 = vmatprep.subr.bf16.mxu1 %v6098_v3  ;;  %5252 = vmatprep.mubr.msk.f32.mxu1 %vm6099_vm0, %v6100_v8 }
   0x2   :  { %v542_v4 = vand.u32 4294901760, %v4910_v0  ;;  %v545_v5 = vand.u32 4294901760, %v4911_v1  ;;  %v4913_v6 = vld [vmem:[%s6770_s1 + $0x38] sm:$0xff]  ;;  %v548_v7 = vand.u32 4294901760, %v4912_v2  ;;  %v27_v9 = vld [vmem:[%s6769_s0] sm:$0x3]  ;;  %5742 = vmatprep.subr.bf16.mxu0 %v6098_v3  ;;  %5186 = vmatprep.mubr.msk.f32.mxu0 %vm6099_vm0, %v6100_v8 }
   0x3   :  { %v551_v10 = vand.u32 4294901760, %v4913_v6  ;;  %v28_v11 = vld [vmem:[%s6770_s1] sm:$0xff]  ;;  %v29_v16 = vld [vmem:[%s6770_s1 + $0x8] sm:$0xff] }
   0x4   :  { %v6166_v12 = vpack.c.bf16 %v545_v5, %v542_v4  ;;  %v6168_v13 = vsub.f32 %v4910_v0, %v542_v4  ;;  %v6170_v14 = vsub.f32 %v4911_v1, %v545_v5  ;;  %v6172_v15 = vsub.f32 %v4912_v2, %v548_v7 }
   0x5   :  { %12 = vsyncpa [#allocation3], 0  ;;  %v6177_v17 = vpack.c.bf16 %v551_v10, %v548_v7  ;;  %v6179_v18 = vsub.f32 %v4913_v6, %v551_v10  ;;  %v41_v19 = vsel %vm39_vm1, %v27_v9, 0  ;;  %v44_v20 = vand.u32 4294901760, %v28_v11  ;;  %v30_v25 = vld [vmem:[%s6770_s1 + $0x10] sm:$0xff]  ;;  %v31_v33 = vld [vmem:[%s6770_s1 + $0x18] sm:$0xff] }
   0x6   :  { %5780 = vmatpush3.bf16.msra.mxu1 %v6166_v12  ;;  %v6182_v21 = vand.u32 4294901760, %v41_v19  ;;  %v623_v22 = vand.u32 4294901760, %v6168_v13  ;;  %v630_v23 = vand.u32 4294901760, %v6170_v14  ;;  %v637_v24 = vand.u32 4294901760, %v6172_v15  ;;  %s6101_s24 = smov [#allocation2]  }
   0x7   :  { %5781 = vmatprep.subr.bf16.mxu1 %v6098_v3  ;;  %v644_v26 = vand.u32 4294901760, %v6179_v18  ;;  %v47_v27 = vand.u32 4294901760, %v29_v16  ;;  %v6192_v28 = vsub.f32 %v28_v11, %v44_v20  ;;  %v50_v37 = vand.u32 4294901760, %v30_v25  ;;  %v4916_v11 = vld [vmem:[%s6773_s4 + $0x28] sm:$0xff]  ;;  %s4901_s25 = sshll.u32 %s6101_s24, 4  ;;  %s4902_s25 = int_to_ptr.vmem [resolvable:$true] %s4901_s25 }
   0x8   :  { %v6195_v29 = vsub.f32 %v41_v19, %v6182_v21  ;;  %v624_v30 = vsub.f32 %v6168_v13, %v623_v22  ;;  %v631_v31 = vsub.f32 %v6170_v14, %v630_v23  ;;  %v638_v32 = vsub.f32 %v6172_v15, %v637_v24  ;;  %s6074_s26 = scalar_lea.vmem %s4902_s25, 32  ;;  %p6079_p1 = scmp.lt.s32.totalorder %s4902_s25, %s4902_s25 }
   0x9   :  { %v645_v34 = vsub.f32 %v6179_v18, %v644_v26  ;;  %v6212_v35 = vpack.c.bf16 %v47_v27, %v44_v20  ;;  %v6214_v36 = vsub.f32 %v29_v16, %v47_v27  ;;  %v53_v42 = vand.u32 4294901760, %v31_v33  ;;  %v4918_v16 = vld [vmem:[%s6773_s4 + $0x38] sm:$0xff]  ;;  %p6075_p0 = scmp.ne.s32.totalorder %s4902_s25, %s6074_s26  ;;  %p6080_p2 = scmp.lt.s32.totalorder %s6074_s26, %s6074_s26 }
   0xa   :  { %5783 = vmatpush3.bf16.msra.mxu1 %v6177_v17  ;;  %v6218_v38 = vand.u32 4294901760, %v6195_v29  ;;  %v625_v39 = vand.u32 4294901760, %v624_v30  ;;  %v632_v40 = vand.u32 4294901760, %v631_v31  ;;  %v639_v41 = vand.u32 4294901760, %v638_v32 }
   0xb   :  { %5784 = vmatprep.subr.bf16.mxu1 %v6098_v3  ;;  %5744 = vmatpush3.bf16.msra.mxu0 %v6212_v35  ;;  %v6222_v43 = vsub.f32 %v30_v25, %v50_v37  ;;  %v646_v45 = vand.u32 4294901760, %v645_v34  ;;  %v125_v46 = vand.u32 4294901760, %v6192_v28  ;;  %v132_v47 = vand.u32 4294901760, %v6214_v36  ;;  %v4920_v25 = vld [vmem:[%s6773_s4 + $0x48] sm:$0xf]  ;;  %p6081_p3 = por %p6080_p2, %p6079_p1 }
   0xc   :  { %v115_v44 = vsub.f32 %v6195_v29, %v6218_v38  ;;  %5745 = vmatprep.subr.bf16.mxu0 %v6098_v3  ;;  %v5785_v48 = vpack.c.bf16 %v632_v40, %v625_v39  ;;  %v6229_v49 = vpack.c.bf16 %v53_v42, %v50_v37  ;;  %v6231_v50 = vsub.f32 %v31_v33, %v53_v42 }
   0xd   :  { %v139_v51 = vand.u32 4294901760, %v6222_v43  ;;  %v126_v53 = vsub.f32 %v6192_v28, %v125_v46  ;;  %v133_v54 = vsub.f32 %v6214_v36, %v132_v47  ;;  %v5788_v59 = vpack.c.bf16 %v646_v45, %v639_v41  ;;  %p6082_p4 = pnand %p6081_p3, %p6075_p0 }
   0xe   :  { %v116_v52 = vand.u32 4294901760, %v115_v44  ;;  %v146_v56 = vand.u32 4294901760, %v6231_v50  ;;  %v5791_v0 = vpack.c.bf16 %v6170_v14, %v6168_v13  ;;  %v5755_v2 = vpack.c.bf16 %v6214_v36, %v6192_v28 }
   0xf   :  { %5747 = vmatpush3.bf16.msra.mxu0 %v6229_v49  ;;  %v140_v55 = vsub.f32 %v6222_v43, %v139_v51  ;;  %v127_v57 = vand.u32 4294901760, %v126_v53  ;;  %v134_v58 = vand.u32 4294901760, %v133_v54  ;;  %v5794_v4 = vpack.c.bf16 %v6179_v18, %v6172_v15 }
  0x10   :  { %5253 = vmatmul.mubr.f32.vlgmr.msra.gmra.mrb[0].mxu1 %v116_v52  ;;  %5748 = vmatprep.subr.bf16.mxu0 %v6098_v3  ;;  %v147_v61 = vsub.f32 %v6231_v50, %v146_v56  ;;  %v5758_v5 = vpack.c.bf16 %v6231_v50, %v6222_v43  ;;  %v5803_v6 = vpack.c.bf16 %v630_v23, %v623_v22  ;;  %v1046_v13 = vand.u32 4294901760, %v4916_v11 }
  0x11   :  { %5786 = vmatpush3.bf16.msra.mxu1 %v5785_v48  ;;  %5263 = vmatprep.mubr.msk.f32.mxu1 %vm6099_vm0, %v6100_v8  ;;  %v141_v60 = vand.u32 4294901760, %v140_v55  ;;  %v5749_v62 = vpack.c.bf16 %v134_v58, %v127_v57  ;;  %v5767_v7 = vpack.c.bf16 %v132_v47, %v125_v46  ;;  %v5806_v9 = vpack.c.bf16 %v644_v26, %v637_v24  ;;  %v4915_v46 = vld [vmem:[%s6771_s2 + $0x1] ss:$0 sm:$0xff] }
  0x12   :  { %5787 = vmatprep.subr.bf16.mxu1 %v6098_v3  ;;  %5187 = vmatmul.mubr.f32.vlgmr.msra.gmra.mrb[0].mxu0 %v116_v52  ;;  %v148_v63 = vand.u32 4294901760, %v147_v61  ;;  %v5770_v10 = vpack.c.bf16 %v146_v56, %v139_v51  ;;  %v1052_v18 = vand.u32 4294901760, %v4918_v16  ;;  %v1127_v20 = vsub.f32 %v4916_v11, %v1046_v13 }
  0x13   :  { %5197 = vmatprep.mubr.msk.f32.mxu0 %vm6099_vm0, %v6100_v8  ;;  %5750 = vmatpush3.bf16.msra.mxu0 %v5749_v62  ;;  %vm1041_vm2 = vcmask 1043456   ;;  %vm1037_vm3 = vcmask 293888   ;;  %v4909_v62 = vld [vmem:[%s6771_s2] ss:$0 sm:$0xff]  ;;  %vm2053_vm4 = vcmask 1041408   ;;  %vm2049_vm5 = vcmask 15360  }
  0x14   :  { %5751 = vmatprep.subr.bf16.mxu0 %v6098_v3  ;;  %v5752_v1 = vpack.c.bf16 %v148_v63, %v141_v60  ;;  %v1128_v23 = vand.u32 4294901760, %v1127_v20  ;;  %v1043_v28 = vsel %vm1041_vm2, %v4920_v25, 0  ;;  %vm4893_vm6 = vcmask 287744  }
  0x15   :  { %5789 = vmatpush3.bf16.msra.mxu1 %v5788_v59  ;;  %v6347_v31 = vand.u32 4294901760, %v1043_v28 }
  0x16   :  { %5790 = vmatprep.subr.bf16.mxu1 %v6098_v3  ;;  %v1129_v26 = vsub.f32 %v1127_v20, %v1128_v23 }
  0x17   :  { %5753 = vmatpush3.bf16.msra.mxu0 %v5752_v1  ;;  %v6374_v55 = vsub.f32 %v1043_v28, %v6347_v31  ;;  %v1027_v1 = vld [vmem:[%s6773_s4 + $0x8] sm:$0xff] }
  0x18   :  { %5264 = vmatmul.mubr.f32.vlgmr.msra.gmra.mrb[0].mxu1 %v6182_v21  ;;  %5754 = vmatprep.subr.bf16.mxu0 %v6098_v3  ;;  %v1130_v32 = vand.u32 4294901760, %v1129_v26 }
  0x19   :  { %5792 = vmatpush3.bf16.msra.mxu1 %v5791_v0  ;;  %5274 = vmatprep.mubr.msk.f32.mxu1 %vm6099_vm0, %v6100_v8  ;;  %v6377_v58 = vand.u32 4294901760, %v6374_v55  ;;  %v1026_v0 = vld [vmem:[%s6773_s4] sm:$0xff] }
  0x1a   :  { %5793 = vmatprep.subr.bf16.mxu1 %v6098_v3  ;;  %5198 = vmatmul.mubr.f32.vlgmr.msra.gmra.mrb[0].mxu0 %v6182_v21 }
  0x1b   :  { %5756 = vmatpush3.bf16.msra.mxu0 %v5755_v2  ;;  %5208 = vmatprep.mubr.msk.f32.mxu0 %vm6099_vm0, %v6100_v8  ;;  %v1157_v60 = vsub.f32 %v6374_v55, %v6377_v58  ;;  %v1550_v2 = vand.u32 4294901760, %v1026_v0 }
  0x1c   :  { %5757 = vmatprep.subr.bf16.mxu0 %v6098_v3 }
  0x1d   :  { %5795 = vmatpush3.bf16.msra.mxu1 %v5794_v4  ;;  %v6386_v61 = vand.u32 4294901760, %v1157_v60 }
  0x1e   :  { %5796 = vmatprep.subr.bf16.mxu1 %v6098_v3 }
  0x1f   :  { %5759 = vmatpush3.bf16.msra.mxu0 %v5758_v5  ;;  %v1553_v5 = vand.u32 4294901760, %v1027_v1 }
  0x20   :  { %5275 = vmatmul.mubr.f32.vlgmr.msra.gmra.mrb[0].mxu1 %v6195_v29  ;;  %5760 = vmatprep.subr.bf16.mxu0 %v6098_v3 }
  0x21   :  { %5798 = vmatpush3.bf16.msra.mxu1 %v6166_v12  ;;  %5285 = vmatprep.mubr.msk.f32.mxu1 %vm6099_vm0, %v6100_v8 }
  0x22   :  { %5799 = vmatprep.subr.bf16.mxu1 %v6098_v3  ;;  %5209 = vmatmul.mubr.f32.vlgmr.msra.gmra.mrb[0].mxu0 %v6195_v29  ;;  %v1141_v29 = vsub.f32 %v4918_v16, %v1052_v18  ;;  %v1030_v16 = vld [vmem:[%s6773_s4 + $0x20] sm:$0xf] }
  0x23   :  { %5762 = vmatpush3.bf16.msra.mxu0 %v6212_v35  ;;  %5219 = vmatprep.mubr.msk.f32.mxu0 %vm6099_vm0, %v6100_v8 }
  0x24   :  { %5763 = vmatprep.subr.bf16.mxu0 %v6098_v3  ;;  %v1142_v34 = vand.u32 4294901760, %v1141_v29 }
  0x25   :  { %5801 = vmatpush3.bf16.msra.mxu1 %v6177_v17 }
  0x26   :  { %5802 = vmatprep.subr.bf16.mxu1 %v6098_v3  ;;  %v1143_v37 = vsub.f32 %v1141_v29, %v1142_v34 }
  0x27   :  { %5765 = vmatpush3.bf16.msra.mxu0 %v6229_v49 }
  0x28   :  { %5286 = vmatmul.mubr.f32.vlgmr.msra.gmra.mrb[0].mxu1 %v6218_v38  ;;  %5766 = vmatprep.subr.bf16.mxu0 %v6098_v3  ;;  %v1144_v39 = vand.u32 4294901760, %v1143_v37 }
  0x29   :  { %5804 = vmatpush3.bf16.msra.mxu1 %v5803_v6  ;;  %5296 = vmatprep.mubr.msk.f32.mxu1 %vm6099_vm0, %v6100_v8  ;;  %v1028_v6 = vld [vmem:[%s6773_s4 + $0x10] sm:$0xff] }
  0x2a   :  { %5805 = vmatprep.subr.bf16.mxu1 %v6098_v3  ;;  %5220 = vmatmul.mubr.f32.vlgmr.msra.gmra.mrb[0].mxu0 %v6218_v38 }
  0x2b   :  { %5768 = vmatpush3.bf16.msra.mxu0 %v5767_v7  ;;  %5230 = vmatprep.mubr.msk.f32.mxu0 %vm6099_vm0, %v6100_v8  ;;  %v1029_v7 = vld [vmem:[%s6773_s4 + $0x18] sm:$0xff] }
  0x2c   :  { %5769 = vmatprep.subr.bf16.mxu0 %v6098_v3 }
  0x2d   :  { %5807 = vmatpush3.bf16.msra.mxu1 %v5806_v9  ;;  %v6436_v9 = vsub.f32 %v1026_v0, %v1550_v2 }
  0x2e   :  { %5808 = vmatprep.subr.bf16.mxu1 %v6098_v3 }
  0x2f   :  { %5771 = vmatpush3.bf16.msra.mxu0 %v5770_v10  ;;  %v6441_v10 = vsub.f32 %v1027_v1, %v1553_v5 }
  0x30   :  { %5297 = vmatmul.mubr.f32.vlgmr.msra.gmra.mrb[0].mxu1 %v6182_v21  ;;  %5772 = vmatprep.subr.bf16.mxu0 %v6098_v3 }
  0x31   :  { %5810 = vmatpush3.bf16.msra.mxu1 %v6166_v12  ;;  %5307 = vmatprep.mubr.msk.f32.mxu1 %vm6099_vm0, %v6100_v8  ;;  %v4917_v12 = vld [vmem:[%s6773_s4 + $0x30] sm:$0xff] }
  0x32   :  { %5811 = vmatprep.subr.bf16.mxu1 %v6098_v3  ;;  %5231 = vmatmul.mubr.f32.vlgmr.msra.gmra.mrb[0].mxu0 %v6182_v21  ;;  %v1049_v14 = vand.u32 4294901760, %v4917_v12 }
  0x33   :  { %5774 = vmatpush3.bf16.msra.mxu0 %v6212_v35  ;;  %5241 = vmatprep.mubr.msk.f32.mxu0 %vm6099_vm0, %v6100_v8 }
  0x34   :  { %5775 = vmatprep.subr.bf16.mxu0 %v6098_v3  ;;  %v6329_v15 = vpack.c.bf16 %v1049_v14, %v1046_v13  ;;  %v1559_v13 = vand.u32 4294901760, %v1029_v7 }
  0x35   :  { %5813 = vmatpush3.bf16.msra.mxu1 %v6177_v17  ;;  %v4919_v17 = vld [vmem:[%s6773_s4 + $0x40] sm:$0xff] }
  0x36   :  { %5466 = vmatprep.subr.mxu1 %v6100_v8  ;;  %v1055_v19 = vand.u32 4294901760, %v4919_v17 }
  0x37   :  { %5777 = vmatpush3.bf16.msra.mxu0 %v6229_v49 }
  0x38   :  { %5308 = vmatmul.mubr.f32.vlgmr.msra.gmra.mrb[0].mxu1 %v6182_v21  ;;  %5814 = vmatprep.subr.bf16.mxu0 %v6098_v3  ;;  %v6339_v22 = vpack.c.bf16 %v1055_v19, %v1052_v18  ;;  %v1148_v30 = vsub.f32 %v4919_v17, %v1055_v19  ;;  %v1639_v17 = vand.u32 4294901760, %v6441_v10  ;;  %v6454_v19 = vsub.f32 %v1029_v7, %v1559_v13 }
  0x39   :  { %5468 = vmatprep.mubr.msk.f32.mxu1 %vm6099_vm0, %v6100_v8 }
  0x3a   :  { %5242 = vmatmul.mubr.f32.vlgmr.msra.gmra.mrb[0].mxu0 %v6182_v21  ;;  %v1134_v21 = vsub.f32 %v4917_v12, %v1049_v14  ;;  %v1149_v35 = vand.u32 4294901760, %v1148_v30  ;;  %v6357_v43 = vpack.c.bf16 %v1148_v30, %v1141_v29  ;;  %v1556_v12 = vand.u32 4294901760, %v1028_v6 }
  0x3b   :  { %5320 = vmatprep.mubr.msk.f32.mxu0 %vm6099_vm0, %v6100_v8  ;;  %5816 = vmatpush3.bf16.msra.mxu0 %v6329_v15  ;;  %v1632_v14 = vand.u32 4294901760, %v6436_v9  ;;  %v1640_v25 = vsub.f32 %v6441_v10, %v1639_v17 }
  0x3c   :  { %5817 = vmatprep.subr.bf16.mxu0 %v6098_v3  ;;  %v1135_v24 = vand.u32 4294901760, %v1134_v21  ;;  %v1150_v38 = vsub.f32 %v1148_v30, %v1149_v35  ;;  %v6355_v42 = vpack.c.bf16 %v1134_v21, %v1127_v20  ;;  %v6361_v45 = vpack.c.bf16 %v1149_v35, %v1142_v34 }
  0x3d   :  { %v6452_v18 = vsub.f32 %v1028_v6, %v1556_v12  ;;  %v6471_v29 = vpack.c.bf16 %v1559_v13, %v1556_v12 }
  0x3e   :  { %v1136_v27 = vsub.f32 %v1134_v21, %v1135_v24  ;;  %v1151_v40 = vand.u32 4294901760, %v1150_v38  ;;  %v6359_v44 = vpack.c.bf16 %v1135_v24, %v1128_v23  ;;  %v6458_v21 = vpack.c.bf16 %v1553_v5, %v1550_v2 }
  0x3f   :  { %5819 = vmatpush3.bf16.msra.mxu0 %v6339_v22  ;;  %v1547_v23 = vsel %vm1041_vm2, %v1030_v16, 0  ;;  %v1633_v24 = vsub.f32 %v6436_v9, %v1632_v14  ;;  %v1646_v26 = vand.u32 4294901760, %v6452_v18  ;;  %v4921_v16 = vld [vmem:[%s6774_s5 + $0x2] sm:$0x3] }
  0x40   :  { %5318 = vmatprep.subr.mxu0 %v6100_v8  ;;  %v1137_v33 = vand.u32 4294901760, %v1136_v27  ;;  %v6353_v41 = vpack.c.bf16 %v1151_v40, %v1144_v39  ;;  %v1653_v27 = vand.u32 4294901760, %v6454_v19  ;;  %v6473_v30 = vand.u32 4294901760, %v1547_v23 }
  0x41   :  { %v1647_v34 = vsub.f32 %v6452_v18, %v1646_v26 }
  0x42   :  { %v6350_v36 = vpack.c.bf16 %v1137_v33, %v1130_v32  ;;  %v1634_v32 = vand.u32 4294901760, %v1633_v24  ;;  %v1641_v33 = vand.u32 4294901760, %v1640_v25  ;;  %v1654_v35 = vsub.f32 %v6454_v19, %v1653_v27 }
  0x43   :  { %5319 = vmatpush3.msra.mxu0 %v6347_v31  ;;  %v6481_v37 = vsub.f32 %v1547_v23, %v6473_v30  ;;  %v1648_v40 = vand.u32 4294901760, %v1647_v34 }
  0x44   :  { %5820 = vmatprep.subr.bf16.mxu0 %v6098_v3  ;;  %v6485_v39 = vpack.c.bf16 %v1641_v33, %v1634_v32 }
 0x10b   :  { %v1022_v47 = vpop.f32.mrb[0].mxu1 }
 0x10c   :  { %v6366_v48 = vadd.f32 %v4915_v46, %v1022_v47  ;;  %v5309_v49 = vpop.f32.mrb[1].mxu1  ;;  %v1655_v46 = vand.u32 4294901760, %v1654_v35  ;;  %v6488_v47 = vand.u32 4294901760, %v6481_v37 }
 0x10d   :  { %v524_v51 = vpop.f32.mrb[0].mxu0 }
 0x10e   :  { %v1039_v50 = vsel %vm1037_vm3, %v6366_v48, 0  ;;  %v5243_v53 = vpop.f32.mrb[1].mxu0  ;;  %v6415_v63 = vadd.f32 %v4909_v62, %v524_v51  ;;  %v1661_v51 = vsub.f32 %v6481_v37, %v6488_v47 }
 0x10f   :  { %v6370_v52 = vand.u32 4294901760, %v1039_v50  ;;  %v6506_v53 = vpack.c.bf16 %v6441_v10, %v6436_v9 }
 0x110   :  { %v1544_v4 = vsel %vm1037_vm3, %v6415_v63, 0 }
 0x111   :  { %v1116_v54 = vsub.f32 %v1039_v50, %v6370_v52  ;;  %v6443_v11 = vand.u32 4294901760, %v1544_v4  ;;  %v6493_v50 = vpack.c.bf16 %v1655_v46, %v1648_v40 }
 0x113   :  { %v1117_v56 = vand.u32 4294901760, %v1116_v54  ;;  %v1620_v20 = vsub.f32 %v1544_v4, %v6443_v11 }
 0x115   :  { %v1118_v57 = vsub.f32 %v1116_v54, %v1117_v56  ;;  %v1621_v28 = vand.u32 4294901760, %v1620_v20 }
 0x117   :  { %v1119_v59 = vand.u32 4294901760, %v1118_v57  ;;  %v1622_v38 = vsub.f32 %v1620_v20, %v1621_v28  ;;  %v6536_v57 = vpack.c.bf16 %v1653_v27, %v1646_v26 }
 0x119   :  { %5321 = vmatmul.mubr.f32.vlgmr.msra.gmra.mrb[2].mxu0 %v1119_v59  ;;  %v1623_v49 = vand.u32 4294901760, %v1622_v38  ;;  %v2048_v59 = vld [vmem:[%s6774_s5] sm:$0x3] }
 0x11a   :  { %5822 = vmatpush3.bf16.msra.mxu0 %v6350_v36  ;;  %5333 = vmatprep.mubr.msk.f32.mxu0 %vm6099_vm0, %v6100_v8  ;;  %v2055_v60 = vsel %vm2053_vm4, %v2048_v59, 0 }
 0x11b   :  { %5823 = vmatprep.subr.bf16.mxu0 %v6098_v3  ;;  %v2058_v62 = vand.u32 4294901760, %v2055_v60 }
 0x11d   :  { %5467 = vmatpush3.msra.mxu1 %v2058_v62  ;;  %v2135_v0 = vsub.f32 %v2055_v60, %v2058_v62 }
 0x11e   :  { %5825 = vmatpush3.bf16.msra.mxu0 %v6353_v41  ;;  %5471 = vmatprep.subr.mxu1 %v6100_v8 }
 0x11f   :  { %5331 = vmatprep.subr.mxu0 %v6100_v8  ;;  %v2136_v6 = vand.u32 4294901760, %v2135_v0 }
 0x121   :  { %v2137_v10 = vsub.f32 %v2135_v0, %v2136_v6 }
 0x122   :  { %5332 = vmatpush3.msra.mxu0 %v6386_v61 }
 0x123   :  { %5334 = vmatmul.mubr.f32.vlgmr.msra.gmra.mrb[2].mxu0 %v6370_v52  ;;  %5826 = vmatprep.subr.bf16.mxu0 %v6098_v3  ;;  %v2138_v13 = vand.u32 4294901760, %v2137_v10 }
 0x124   :  { %5828 = vmatpush3.bf16.msra.mxu0 %v6355_v42  ;;  %5346 = vmatprep.mubr.msk.f32.mxu0 %vm6099_vm0, %v6100_v8 }
 0x125   :  { %5829 = vmatprep.subr.bf16.mxu0 %v6098_v3 }
 0x128   :  { %5831 = vmatpush3.bf16.msra.mxu0 %v6357_v43 }
 0x129   :  { %5344 = vmatprep.subr.mxu0 %v6100_v8 }
 0x12c   :  { %5345 = vmatpush3.msra.mxu0 %v6374_v55 }
 0x12d   :  { %5347 = vmatmul.mubr.f32.vlgmr.msra.gmra.mrb[2].mxu0 %v1116_v54  ;;  %5832 = vmatprep.subr.bf16.mxu0 %v6098_v3  ;;  %v6514_v54 = vpack.c.bf16 %v6454_v19, %v6452_v18 }
 0x12e   :  { %5834 = vmatpush3.bf16.msra.mxu0 %v6329_v15  ;;  %5359 = vmatprep.mubr.msk.f32.mxu0 %vm6099_vm0, %v6100_v8 }
 0x12f   :  { %5835 = vmatprep.subr.bf16.mxu0 %v6098_v3 }
 0x132   :  { %5837 = vmatpush3.bf16.msra.mxu0 %v6339_v22 }
 0x133   :  { %5357 = vmatprep.subr.mxu0 %v6100_v8 }
 0x136   :  { %5358 = vmatpush3.msra.mxu0 %v6347_v31 }
 0x137   :  { %5360 = vmatmul.mubr.f32.vlgmr.msra.gmra.mrb[2].mxu0 %v1117_v56  ;;  %5838 = vmatprep.subr.bf16.mxu0 %v6098_v3  ;;  %v6531_v56 = vpack.c.bf16 %v1639_v17, %v1632_v14  ;;  %v2506_v17 = vsel %vm2053_vm4, %v4921_v16, 0  ;;  %v4923_v16 = vld [vmem:[%s6772_s3] ss:$0 sm:$0xff] }
 0x138   :  { %5840 = vmatpush3.bf16.msra.mxu0 %v6359_v44  ;;  %5372 = vmatprep.mubr.msk.f32.mxu0 %vm6099_vm0, %v6100_v8  ;;  %v2509_v18 = vand.u32 4294901760, %v2506_v17 }
 0x139   :  { %5841 = vmatprep.subr.bf16.mxu0 %v6098_v3 }
 0x13a   :  { %v2586_v19 = vsub.f32 %v2506_v17, %v2509_v18 }
 0x13c   :  { %5843 = vmatpush3.bf16.msra.mxu0 %v6361_v45 }
 0x13d   :  { %5370 = vmatprep.subr.mxu0 %v6100_v8 }
 0x140   :  { %5371 = vmatpush3.msra.mxu0 %v6377_v58 }
 0x141   :  { %5373 = vmatmul.mubr.f32.vlgmr.msra.gmra.mrb[2].mxu0 %v6370_v52  ;;  %5844 = vmatprep.subr.bf16.mxu0 %v6098_v3 }
 0x142   :  { %5846 = vmatpush3.bf16.msra.mxu0 %v6329_v15  ;;  %5385 = vmatprep.mubr.msk.f32.mxu0 %vm6099_vm0, %v6100_v8 }
 0x143   :  { %5847 = vmatprep.subr.bf16.mxu0 %v6098_v3 }
 0x146   :  { %5849 = vmatpush3.bf16.msra.mxu0 %v6339_v22 }
 0x147   :  { %5383 = vmatprep.subr.mxu0 %v6100_v8 }
 0x14a   :  { %5384 = vmatpush3.msra.mxu0 %v6347_v31 }
 0x14b   :  { %5386 = vmatmul.mubr.f32.vlgmr.msra.gmra.mrb[2].mxu0 %v6370_v52  ;;  %5850 = vmatprep.subr.bf16.mxu0 %v6098_v3  ;;  %v6501_v52 = vand.u32 4294901760, %v1661_v51 }
 0x14c   :  { %5852 = vmatpush3.bf16.msra.mxu0 %v6458_v21  ;;  %5398 = vmatprep.mubr.msk.f32.mxu0 %vm6099_vm0, %v6100_v8 }
 0x14d   :  { %5853 = vmatprep.subr.bf16.mxu0 %v6098_v3 }
 0x150   :  { %5855 = vmatpush3.bf16.msra.mxu0 %v6471_v29 }
 0x151   :  { %5396 = vmatprep.subr.mxu0 %v6100_v8 }
 0x154   :  { %5397 = vmatpush3.msra.mxu0 %v6473_v30 }
 0x155   :  { %5399 = vmatmul.mubr.f32.vlgmr.msra.gmra.mrb[2].mxu0 %v1623_v49  ;;  %5856 = vmatprep.subr.bf16.mxu0 %v6098_v3 }
 0x156   :  { %5858 = vmatpush3.bf16.msra.mxu0 %v6485_v39  ;;  %5411 = vmatprep.mubr.msk.f32.mxu0 %vm6099_vm0, %v6100_v8 }
 0x157   :  { %5859 = vmatprep.subr.bf16.mxu0 %v6098_v3 }
 0x15a   :  { %5861 = vmatpush3.bf16.msra.mxu0 %v6493_v50 }
 0x15b   :  { %5409 = vmatprep.subr.mxu0 %v6100_v8 }
 0x15e   :  { %5410 = vmatpush3.msra.mxu0 %v6501_v52 }
 0x15f   :  { %5412 = vmatmul.mubr.f32.vlgmr.msra.gmra.mrb[2].mxu0 %v6443_v11  ;;  %5862 = vmatprep.subr.bf16.mxu0 %v6098_v3 }
 0x160   :  { %5864 = vmatpush3.bf16.msra.mxu0 %v6506_v53  ;;  %5424 = vmatprep.mubr.msk.f32.mxu0 %vm6099_vm0, %v6100_v8 }
 0x161   :  { %5865 = vmatprep.subr.bf16.mxu0 %v6098_v3 }
 0x164   :  { %5867 = vmatpush3.bf16.msra.mxu0 %v6514_v54 }
 0x165   :  { %5422 = vmatprep.subr.mxu0 %v6100_v8 }
 0x168   :  { %5423 = vmatpush3.msra.mxu0 %v6481_v37 }
 0x169   :  { %5425 = vmatmul.mubr.f32.vlgmr.msra.gmra.mrb[2].mxu0 %v1620_v20  ;;  %5868 = vmatprep.subr.bf16.mxu0 %v6098_v3  ;;  %v2587_v20 = vand.u32 4294901760, %v2586_v19 }
 0x16a   :  { %5870 = vmatpush3.bf16.msra.mxu0 %v6458_v21  ;;  %5437 = vmatprep.mubr.msk.f32.mxu0 %vm6099_vm0, %v6100_v8 }
 0x16b   :  { %5871 = vmatprep.subr.bf16.mxu0 %v6098_v3  ;;  %v2588_v23 = vsub.f32 %v2586_v19, %v2587_v20 }
 0x16d   :  { %v2589_v24 = vand.u32 4294901760, %v2588_v23 }
 0x16e   :  { %5873 = vmatpush3.bf16.msra.mxu0 %v6471_v29 }
 0x16f   :  { %5435 = vmatprep.subr.mxu0 %v6100_v8 }
 0x172   :  { %5436 = vmatpush3.msra.mxu0 %v6473_v30 }
 0x173   :  { %5438 = vmatmul.mubr.f32.vlgmr.msra.gmra.mrb[2].mxu0 %v1621_v28  ;;  %5874 = vmatprep.subr.bf16.mxu0 %v6098_v3 }
 0x174   :  { %5876 = vmatpush3.bf16.msra.mxu0 %v6531_v56  ;;  %5450 = vmatprep.mubr.msk.f32.mxu0 %vm6099_vm0, %v6100_v8 }
 0x175   :  { %5877 = vmatprep.subr.bf16.mxu0 %v6098_v3 }
 0x178   :  { %5879 = vmatpush3.bf16.msra.mxu0 %v6536_v57 }
 0x179   :  { %5448 = vmatprep.subr.mxu0 %v6100_v8 }
 0x17c   :  { %5449 = vmatpush3.msra.mxu0 %v6488_v47 }
 0x17d   :  { %5451 = vmatmul.mubr.f32.vlgmr.msra.gmra.mrb[2].mxu0 %v6443_v11  ;;  %5880 = vmatprep.subr.bf16.mxu0 %v6098_v3 }
 0x17e   :  { %5882 = vmatpush3.bf16.msra.mxu0 %v6458_v21  ;;  %5463 = vmatprep.mubr.msk.f32.mxu0 %vm6099_vm0, %v6100_v8 }
 0x17f   :  { %5883 = vmatprep.subr.bf16.mxu0 %v6098_v3 }
 0x182   :  { %5885 = vmatpush3.bf16.msra.mxu0 %v6471_v29 }
 0x183   :  { %5461 = vmatprep.subr.mxu0 %v6100_v8 }
 0x186   :  { %5462 = vmatpush3.msra.mxu0 %v6473_v30 }
 0x187   :  { %5464 = vmatmul.mubr.f32.vlgmr.msra.gmra.mrb[2].mxu0 %v6443_v11  ;;  %5682 = vmatprep.subr.mxu0 %v6100_v8 }
 0x188   :  { %5684 = vmatprep.mubr.msk.f32.mxu0 %vm6099_vm0, %v6100_v8 }
 0x25a   :  { %v2043_v1 = vpop.f32.mrb[2].mxu0 }
 0x25b   :  { %v2047_v2 = vmul.f32 0.027777778, %v2043_v1  ;;  %v5465_v4 = vpop.f32.mrb[3].mxu0 }
 0x25d   :  { %v2051_v5 = vsel %vm2049_vm5, %v2047_v2, 0 }
 0x25e   :  { %v2123_v7 = vand.u32 4294901760, %v2051_v5 }
 0x260   :  { %v2124_v9 = vsub.f32 %v2051_v5, %v2123_v7 }
 0x262   :  { %v2125_v11 = vand.u32 4294901760, %v2124_v9 }
 0x264   :  { %v2126_v12 = vsub.f32 %v2124_v9, %v2125_v11 }
 0x266   :  { %v2127_v14 = vand.u32 4294901760, %v2126_v12 }
 0x268   :  { %5469 = vmatmul.mubr.f32.vlgmr.msra.gmra.mrb[2].mxu1 %v2127_v14 }
 0x269   :  { %5472 = vmatpush3.msra.mxu1 %v2138_v13  ;;  %5473 = vmatprep.mubr.msk.f32.mxu1 %vm6099_vm0, %v6100_v8 }
 0x26a   :  { %5476 = vmatprep.subr.mxu1 %v6100_v8 }
 0x270   :  { %5474 = vmatmul.mubr.f32.vlgmr.msra.gmra.mrb[2].mxu1 %v2123_v7 }
 0x271   :  { %5477 = vmatpush3.msra.mxu1 %v2135_v0  ;;  %5478 = vmatprep.mubr.msk.f32.mxu1 %vm6099_vm0, %v6100_v8 }
 0x272   :  { %5481 = vmatprep.subr.mxu1 %v6100_v8 }
 0x278   :  { %5479 = vmatmul.mubr.f32.vlgmr.msra.gmra.mrb[2].mxu1 %v2124_v9 }
 0x279   :  { %5482 = vmatpush3.msra.mxu1 %v2058_v62  ;;  %5483 = vmatprep.mubr.msk.f32.mxu1 %vm6099_vm0, %v6100_v8 }
 0x27a   :  { %5486 = vmatprep.subr.mxu1 %v6100_v8 }
 0x280   :  { %5484 = vmatmul.mubr.f32.vlgmr.msra.gmra.mrb[2].mxu1 %v2125_v11 }
 0x281   :  { %5487 = vmatpush3.msra.mxu1 %v2136_v6  ;;  %5488 = vmatprep.mubr.msk.f32.mxu1 %vm6099_vm0, %v6100_v8  ;;  %v4925_v6 = vld [vmem:[%s6772_s3 + $0x1] ss:$0 sm:$0xff] }
 0x282   :  { %5491 = vmatprep.subr.mxu1 %v6100_v8 }
 0x288   :  { %5489 = vmatmul.mubr.f32.vlgmr.msra.gmra.mrb[2].mxu1 %v2123_v7 }
 0x289   :  { %5492 = vmatpush3.msra.mxu1 %v2058_v62  ;;  %5493 = vmatprep.mubr.msk.f32.mxu1 %vm6099_vm0, %v6100_v8 }
 0x28a   :  { %5496 = vmatprep.subr.mxu1 %v6100_v8 }
 0x290   :  { %5494 = vmatmul.mubr.f32.vlgmr.msra.gmra.mrb[2].mxu1 %v2123_v7 }
 0x291   :  { %5497 = vmatpush3.msra.mxu1 %v2509_v18  ;;  %5498 = vmatprep.mubr.msk.f32.mxu1 %vm6099_vm0, %v6100_v8 }
 0x292   :  { %5501 = vmatprep.subr.mxu1 %v6100_v8 }
 0x294   :  { %5499 = vmatmul.mubr.f32.vlgmr.msra.gmra.mrb[4].mxu1 %v2127_v14 }
 0x295   :  { %5502 = vmatpush3.msra.mxu1 %v2589_v24  ;;  %5503 = vmatprep.mubr.msk.f32.mxu1 %vm6099_vm0, %v6100_v8 }
 0x296   :  { %5506 = vmatprep.subr.mxu1 %v6100_v8 }
 0x29c   :  { %5504 = vmatmul.mubr.f32.vlgmr.msra.gmra.mrb[4].mxu1 %v2123_v7 }
 0x29d   :  { %5507 = vmatpush3.msra.mxu1 %v2586_v19  ;;  %5508 = vmatprep.mubr.msk.f32.mxu1 %vm6099_vm0, %v6100_v8 }
 0x29e   :  { %5511 = vmatprep.subr.mxu1 %v6100_v8 }
 0x2a4   :  { %5509 = vmatmul.mubr.f32.vlgmr.msra.gmra.mrb[4].mxu1 %v2124_v9 }
 0x2a5   :  { %5512 = vmatpush3.msra.mxu1 %v2509_v18  ;;  %5513 = vmatprep.mubr.msk.f32.mxu1 %vm6099_vm0, %v6100_v8 }
 0x2a6   :  { %5516 = vmatprep.subr.mxu1 %v6100_v8 }
 0x2ac   :  { %5514 = vmatmul.mubr.f32.vlgmr.msra.gmra.mrb[4].mxu1 %v2125_v11 }
 0x2ad   :  { %5517 = vmatpush3.msra.mxu1 %v2587_v20  ;;  %5518 = vmatprep.mubr.msk.f32.mxu1 %vm6099_vm0, %v6100_v8 }
 0x2ae   :  { %5521 = vmatprep.subr.mxu1 %v6100_v8 }
 0x2b4   :  { %5519 = vmatmul.mubr.f32.vlgmr.msra.gmra.mrb[4].mxu1 %v2123_v7 }
 0x2b5   :  { %5522 = vmatpush3.msra.mxu1 %v2509_v18  ;;  %5523 = vmatprep.mubr.msk.f32.mxu1 %vm6099_vm0, %v6100_v8 }
 0x2b6   :  { %5886 = vmatprep.subr.bf16.mxu1 %v6098_v3 }
 0x2bc   :  { %5524 = vmatmul.mubr.f32.vlgmr.msra.gmra.mrb[4].mxu1 %v2123_v7 }
 0x2bd   :  { %5888 = vmatpush3.bf16.msra.mxu1 %v6329_v15  ;;  %5536 = vmatprep.mubr.msk.f32.mxu1 %vm6099_vm0, %v6100_v8 }
 0x2be   :  { %5889 = vmatprep.subr.bf16.mxu1 %v6098_v3 }
 0x2c1   :  { %5891 = vmatpush3.bf16.msra.mxu1 %v6339_v22 }
 0x2c2   :  { %5534 = vmatprep.subr.mxu1 %v6100_v8 }
 0x2c5   :  { %5535 = vmatpush3.msra.mxu1 %v6347_v31 }
 0x2c6   :  { %5892 = vmatprep.subr.bf16.mxu1 %v6098_v3 }
 0x363   :  { %v2499_v25 = vpop.f32.mrb[2].mxu1 }
 0x364   :  { %v5495_v26 = vpop.f32.mrb[3].mxu1 }
 0x38f   :  { %v2950_v27 = vpop.f32.mrb[4].mxu1 }
 0x390   :  { %v6609_v28 = vsub.f32 %v6366_v48, %v2950_v27  ;;  %v5525_v32 = vpop.f32.mrb[5].mxu1 }
 0x392   :  { %v2957_v33 = vmul.f32 %v6609_v28, %v6609_v28 }
 0x394   :  { %v2959_v34 = vsel %vm1037_vm3, %v2957_v33, 0 }
 0x395   :  { %v3031_v35 = vand.u32 4294901760, %v2959_v34 }
 0x397   :  { %v3032_v38 = vsub.f32 %v2959_v34, %v3031_v35 }
 0x399   :  { %v3033_v40 = vand.u32 4294901760, %v3032_v38 }
 0x39b   :  { %v3034_v46 = vsub.f32 %v3032_v38, %v3033_v40 }
 0x39d   :  { %v3035_v49 = vand.u32 4294901760, %v3034_v46 }
 0x39f   :  { %5537 = vmatmul.mubr.f32.vlgmr.msra.gmra.mrb[6].mxu1 %v3035_v49 }
 0x3a0   :  { %5894 = vmatpush3.bf16.msra.mxu1 %v6350_v36  ;;  %5549 = vmatprep.mubr.msk.f32.mxu1 %vm6099_vm0, %v6100_v8  ;;  %v6639_v36 = vsub.f32 %v6415_v63, %v2499_v25 }
 0x3a1   :  { %5895 = vmatprep.subr.bf16.mxu1 %v6098_v3 }
 0x3a4   :  { %5897 = vmatpush3.bf16.msra.mxu1 %v6353_v41  ;;  %v2956_v41 = vmul.f32 %v6639_v36, %v6639_v36 }
 0x3a5   :  { %5547 = vmatprep.subr.mxu1 %v6100_v8 }
 0x3a8   :  { %5548 = vmatpush3.msra.mxu1 %v6386_v61 }
 0x3a9   :  { %5550 = vmatmul.mubr.f32.vlgmr.msra.gmra.mrb[6].mxu1 %v3031_v35  ;;  %5898 = vmatprep.subr.bf16.mxu1 %v6098_v3 }
 0x3aa   :  { %5900 = vmatpush3.bf16.msra.mxu1 %v6355_v42  ;;  %5562 = vmatprep.mubr.msk.f32.mxu1 %vm6099_vm0, %v6100_v8  ;;  %v3460_v42 = vsel %vm1037_vm3, %v2956_v41, 0 }
 0x3ab   :  { %5901 = vmatprep.subr.bf16.mxu1 %v6098_v3 }
 0x3ae   :  { %5903 = vmatpush3.bf16.msra.mxu1 %v6357_v43  ;;  %v3532_v43 = vand.u32 4294901760, %v3460_v42 }
 0x3af   :  { %5560 = vmatprep.subr.mxu1 %v6100_v8 }
 0x3b2   :  { %5561 = vmatpush3.msra.mxu1 %v6374_v55 }
 0x3b3   :  { %5563 = vmatmul.mubr.f32.vlgmr.msra.gmra.mrb[6].mxu1 %v3032_v38  ;;  %5904 = vmatprep.subr.bf16.mxu1 %v6098_v3 }
 0x3b4   :  { %5906 = vmatpush3.bf16.msra.mxu1 %v6329_v15  ;;  %5575 = vmatprep.mubr.msk.f32.mxu1 %vm6099_vm0, %v6100_v8 }
 0x3b5   :  { %5907 = vmatprep.subr.bf16.mxu1 %v6098_v3 }
 0x3b8   :  { %5909 = vmatpush3.bf16.msra.mxu1 %v6339_v22 }
 0x3b9   :  { %5573 = vmatprep.subr.mxu1 %v6100_v8 }
 0x3bc   :  { %5574 = vmatpush3.msra.mxu1 %v6347_v31 }
 0x3bd   :  { %5576 = vmatmul.mubr.f32.vlgmr.msra.gmra.mrb[6].mxu1 %v3033_v40  ;;  %5910 = vmatprep.subr.bf16.mxu1 %v6098_v3 }
 0x3be   :  { %5912 = vmatpush3.bf16.msra.mxu1 %v6359_v44  ;;  %5588 = vmatprep.mubr.msk.f32.mxu1 %vm6099_vm0, %v6100_v8  ;;  %v3533_v44 = vsub.f32 %v3460_v42, %v3532_v43 }
 0x3bf   :  { %5913 = vmatprep.subr.bf16.mxu1 %v6098_v3 }
 0x3c2   :  { %5915 = vmatpush3.bf16.msra.mxu1 %v6361_v45  ;;  %v3534_v45 = vand.u32 4294901760, %v3533_v44 }
 0x3c3   :  { %5586 = vmatprep.subr.mxu1 %v6100_v8 }
 0x3c6   :  { %5587 = vmatpush3.msra.mxu1 %v6377_v58 }
 0x3c7   :  { %5589 = vmatmul.mubr.f32.vlgmr.msra.gmra.mrb[6].mxu1 %v3031_v35  ;;  %5916 = vmatprep.subr.bf16.mxu1 %v6098_v3 }
 0x3c8   :  { %5918 = vmatpush3.bf16.msra.mxu1 %v6329_v15  ;;  %5601 = vmatprep.mubr.msk.f32.mxu1 %vm6099_vm0, %v6100_v8  ;;  %v3535_v15 = vsub.f32 %v3533_v44, %v3534_v45 }
 0x3c9   :  { %5919 = vmatprep.subr.bf16.mxu1 %v6098_v3 }
 0x3cc   :  { %5921 = vmatpush3.bf16.msra.mxu1 %v6339_v22  ;;  %v3536_v22 = vand.u32 4294901760, %v3535_v15 }
 0x3cd   :  { %5599 = vmatprep.subr.mxu1 %v6100_v8 }
 0x3d0   :  { %5600 = vmatpush3.msra.mxu1 %v6347_v31  ;;  %v3963_v31 = vld [vmem:[%s6775_s6] sm:$0x3] }
 0x3d1   :  { %5602 = vmatmul.mubr.f32.vlgmr.msra.gmra.mrb[6].mxu1 %v3031_v35  ;;  %5922 = vmatprep.subr.bf16.mxu1 %v6098_v3  ;;  %v3968_v48 = vsel %vm2053_vm4, %v3963_v31, 0 }
 0x3d2   :  { %5924 = vmatpush3.bf16.msra.mxu1 %v6458_v21  ;;  %5614 = vmatprep.mubr.msk.f32.mxu1 %vm6099_vm0, %v6100_v8  ;;  %v3971_v55 = vand.u32 4294901760, %v3968_v48 }
 0x3d3   :  { %5925 = vmatprep.subr.bf16.mxu1 %v6098_v3 }
 0x3d4   :  { %5683 = vmatpush3.msra.mxu0 %v3971_v55 }
 0x3d5   :  { %5687 = vmatprep.subr.mxu0 %v6100_v8 }
 0x3d6   :  { %5927 = vmatpush3.bf16.msra.mxu1 %v6471_v29 }
 0x3d7   :  { %5612 = vmatprep.subr.mxu1 %v6100_v8 }
 0x3da   :  { %5613 = vmatpush3.msra.mxu1 %v6473_v30 }
 0x3db   :  { %5615 = vmatmul.mubr.f32.vlgmr.msra.gmra.mrb[6].mxu1 %v3536_v22  ;;  %5928 = vmatprep.subr.bf16.mxu1 %v6098_v3 }
 0x3dc   :  { %5930 = vmatpush3.bf16.msra.mxu1 %v6485_v39  ;;  %5627 = vmatprep.mubr.msk.f32.mxu1 %vm6099_vm0, %v6100_v8 }
 0x3dd   :  { %5931 = vmatprep.subr.bf16.mxu1 %v6098_v3 }
 0x3e0   :  { %5933 = vmatpush3.bf16.msra.mxu1 %v6493_v50 }
 0x3e1   :  { %5625 = vmatprep.subr.mxu1 %v6100_v8 }
 0x3e4   :  { %5626 = vmatpush3.msra.mxu1 %v6501_v52 }
 0x3e5   :  { %5628 = vmatmul.mubr.f32.vlgmr.msra.gmra.mrb[6].mxu1 %v3532_v43  ;;  %5934 = vmatprep.subr.bf16.mxu1 %v6098_v3 }
 0x3e6   :  { %5936 = vmatpush3.bf16.msra.mxu1 %v6506_v53  ;;  %5640 = vmatprep.mubr.msk.f32.mxu1 %vm6099_vm0, %v6100_v8 }
 0x3e7   :  { %5937 = vmatprep.subr.bf16.mxu1 %v6098_v3 }
 0x3ea   :  { %5939 = vmatpush3.bf16.msra.mxu1 %v6514_v54 }
 0x3eb   :  { %5638 = vmatprep.subr.mxu1 %v6100_v8 }
 0x3ee   :  { %5639 = vmatpush3.msra.mxu1 %v6481_v37 }
 0x3ef   :  { %5641 = vmatmul.mubr.f32.vlgmr.msra.gmra.mrb[6].mxu1 %v3533_v44  ;;  %5940 = vmatprep.subr.bf16.mxu1 %v6098_v3 }
 0x3f0   :  { %5942 = vmatpush3.bf16.msra.mxu1 %v6458_v21  ;;  %5653 = vmatprep.mubr.msk.f32.mxu1 %vm6099_vm0, %v6100_v8 }
 0x3f1   :  { %5943 = vmatprep.subr.bf16.mxu1 %v6098_v3 }
 0x3f4   :  { %5945 = vmatpush3.bf16.msra.mxu1 %v6471_v29 }
 0x3f5   :  { %5651 = vmatprep.subr.mxu1 %v6100_v8 }
 0x3f8   :  { %5652 = vmatpush3.msra.mxu1 %v6473_v30 }
 0x3f9   :  { %5654 = vmatmul.mubr.f32.vlgmr.msra.gmra.mrb[6].mxu1 %v3534_v45  ;;  %5946 = vmatprep.subr.bf16.mxu1 %v6098_v3 }
 0x3fa   :  { %5948 = vmatpush3.bf16.msra.mxu1 %v6531_v56  ;;  %5666 = vmatprep.mubr.msk.f32.mxu1 %vm6099_vm0, %v6100_v8  ;;  %v4922_v56 = vld [vmem:[%s6775_s6 + $0x2] sm:$0x3] }
 0x3fb   :  { %5949 = vmatprep.subr.bf16.mxu1 %v6098_v3 }
 0x3fe   :  { %5951 = vmatpush3.bf16.msra.mxu1 %v6536_v57  ;;  %v4419_v57 = vsel %vm2053_vm4, %v4922_v56, 0 }
 0x3ff   :  { %5664 = vmatprep.subr.mxu1 %v6100_v8  ;;  %v4422_v59 = vand.u32 4294901760, %v4419_v57 }
 0x401   :  { %v4499_v60 = vsub.f32 %v4419_v57, %v4422_v59 }
 0x402   :  { %5665 = vmatpush3.msra.mxu1 %v6488_v47 }
 0x403   :  { %5667 = vmatmul.mubr.f32.vlgmr.msra.gmra.mrb[6].mxu1 %v3532_v43  ;;  %5952 = vmatprep.subr.bf16.mxu1 %v6098_v3  ;;  %v4500_v62 = vand.u32 4294901760, %v4499_v60 }
 0x404   :  { %5954 = vmatpush3.bf16.msra.mxu1 %v6458_v21  ;;  %5679 = vmatprep.mubr.msk.f32.mxu1 %vm6099_vm0, %v6100_v8  ;;  %v4048_v21 = vsub.f32 %v3968_v48, %v3971_v55 }
 0x405   :  { %5955 = vmatprep.subr.bf16.mxu1 %v6098_v3  ;;  %v4501_v0 = vsub.f32 %v4499_v60, %v4500_v62 }
 0x406   :  { %v4049_v37 = vand.u32 4294901760, %v4048_v21 }
 0x407   :  { %v4502_v1 = vand.u32 4294901760, %v4501_v0 }
 0x408   :  { %5957 = vmatpush3.bf16.msra.mxu1 %v6471_v29  ;;  %v4050_v50 = vsub.f32 %v4048_v21, %v4049_v37 }
 0x409   :  { %5677 = vmatprep.subr.mxu1 %v6100_v8 }
 0x40a   :  { %v4051_v53 = vand.u32 4294901760, %v4050_v50 }
 0x40c   :  { %5678 = vmatpush3.msra.mxu1 %v6473_v30 }
 0x40d   :  { %5680 = vmatmul.mubr.f32.vlgmr.msra.gmra.mrb[6].mxu1 %v3532_v43 }
 0x4e0   :  { %v3956_v58 = vpop.f32.mrb[6].mxu1 }
 0x4e1   :  { %v3960_v61 = vmul.f32 0.027777778, %v3956_v58  ;;  %v5681_v3 = vpop.f32.mrb[7].mxu1 }
 0x4e3   :  { %v3961_v63 = vadd.f32 1e-05, %v3960_v61 }
 0x4e5   :  { %6068 = vrsqrt.f32 %v3961_v63 }
 0x4ef   :  { %v6069_v29 = vpop.eup %6068 }
 0x4f0   :  { %v3965_v30 = vsel %vm2049_vm5, %v6069_v29, 0 }
 0x4f1   :  { %v4036_v39 = vand.u32 4294901760, %v3965_v30 }
 0x4f3   :  { %v4037_v47 = vsub.f32 %v3965_v30, %v4036_v39 }
 0x4f5   :  { %v4038_v51 = vand.u32 4294901760, %v4037_v47 }
 0x4f7   :  { %v4039_v52 = vsub.f32 %v4037_v47, %v4038_v51 }
 0x4f9   :  { %v4040_v54 = vand.u32 4294901760, %v4039_v52 }
 0x4fb   :  { %5685 = vmatmul.mubr.f32.vlgmr.msra.gmra.mrb[4].mxu0 %v4040_v54 }
 0x4fc   :  { %5688 = vmatpush3.msra.mxu0 %v4051_v53  ;;  %5689 = vmatprep.mubr.msk.f32.mxu0 %vm6099_vm0, %v6100_v8 }
 0x4fd   :  { %5692 = vmatprep.subr.mxu0 %v6100_v8 }
 0x503   :  { %5690 = vmatmul.mubr.f32.vlgmr.msra.gmra.mrb[4].mxu0 %v4036_v39 }
 0x504   :  { %5693 = vmatpush3.msra.mxu0 %v4048_v21  ;;  %5694 = vmatprep.mubr.msk.f32.mxu0 %vm6099_vm0, %v6100_v8 }
 0x505   :  { %5697 = vmatprep.subr.mxu0 %v6100_v8 }
 0x50b   :  { %5695 = vmatmul.mubr.f32.vlgmr.msra.gmra.mrb[4].mxu0 %v4037_v47 }
 0x50c   :  { %5698 = vmatpush3.msra.mxu0 %v3971_v55  ;;  %5699 = vmatprep.mubr.msk.f32.mxu0 %vm6099_vm0, %v6100_v8 }
 0x50d   :  { %5702 = vmatprep.subr.mxu0 %v6100_v8 }
 0x513   :  { %5700 = vmatmul.mubr.f32.vlgmr.msra.gmra.mrb[4].mxu0 %v4038_v51 }
 0x514   :  { %5703 = vmatpush3.msra.mxu0 %v4049_v37  ;;  %5704 = vmatprep.mubr.msk.f32.mxu0 %vm6099_vm0, %v6100_v8 }
 0x515   :  { %5707 = vmatprep.subr.mxu0 %v6100_v8 }
 0x51b   :  { %5705 = vmatmul.mubr.f32.vlgmr.msra.gmra.mrb[4].mxu0 %v4036_v39 }
 0x51c   :  { %5708 = vmatpush3.msra.mxu0 %v3971_v55  ;;  %5709 = vmatprep.mubr.msk.f32.mxu0 %vm6099_vm0, %v6100_v8 }
 0x51d   :  { %5712 = vmatprep.subr.mxu0 %v6100_v8 }
 0x523   :  { %5710 = vmatmul.mubr.f32.vlgmr.msra.gmra.mrb[4].mxu0 %v4036_v39 }
 0x524   :  { %5713 = vmatpush3.msra.mxu0 %v4422_v59  ;;  %5714 = vmatprep.mubr.msk.f32.mxu0 %vm6099_vm0, %v6100_v8 }
 0x525   :  { %5717 = vmatprep.subr.mxu0 %v6100_v8 }
 0x527   :  { %5715 = vmatmul.mubr.f32.vlgmr.msra.gmra.mrb[6].mxu0 %v4040_v54 }
 0x528   :  { %5718 = vmatpush3.msra.mxu0 %v4502_v1  ;;  %5719 = vmatprep.mubr.msk.f32.mxu0 %vm6099_vm0, %v6100_v8 }
 0x529   :  { %5722 = vmatprep.subr.mxu0 %v6100_v8 }
 0x52f   :  { %5720 = vmatmul.mubr.f32.vlgmr.msra.gmra.mrb[6].mxu0 %v4036_v39 }
 0x530   :  { %5723 = vmatpush3.msra.mxu0 %v4499_v60  ;;  %5724 = vmatprep.mubr.msk.f32.mxu0 %vm6099_vm0, %v6100_v8 }
 0x531   :  { %5727 = vmatprep.subr.mxu0 %v6100_v8 }
 0x537   :  { %5725 = vmatmul.mubr.f32.vlgmr.msra.gmra.mrb[6].mxu0 %v4037_v47 }
 0x538   :  { %5728 = vmatpush3.msra.mxu0 %v4422_v59  ;;  %5729 = vmatprep.mubr.msk.f32.mxu0 %vm6099_vm0, %v6100_v8 }
 0x539   :  { %5732 = vmatprep.subr.mxu0 %v6100_v8 }
 0x53f   :  { %5730 = vmatmul.mubr.f32.vlgmr.msra.gmra.mrb[6].mxu0 %v4038_v51 }
 0x540   :  { %5733 = vmatpush3.msra.mxu0 %v4500_v62  ;;  %5734 = vmatprep.mubr.msk.f32.mxu0 %vm6099_vm0, %v6100_v8 }
 0x541   :  { %5737 = vmatprep.subr.mxu0 %v6100_v8 }
 0x547   :  { %5735 = vmatmul.mubr.f32.vlgmr.msra.gmra.mrb[6].mxu0 %v4036_v39 }
 0x548   :  { %5738 = vmatpush3.msra.mxu0 %v4422_v59  ;;  %5739 = vmatprep.mubr.msk.f32.mxu0 %vm6099_vm0, %v6100_v8 }
 0x54f   :  { %5740 = vmatmul.mubr.f32.vlgmr.msra.gmra.mrb[6].mxu0 %v4036_v39 }
 0x5f6   :  { %v4412_v2 = vpop.f32.mrb[4].mxu0 }
 0x5f7   :  { %v5711_v4 = vpop.f32.mrb[5].mxu0  ;;  %v4867_v8 = vmul.f32 %v4412_v2, %v6639_v36 }
 0x5f9   :  { %v4875_v17 = vadd.f32 %v4923_v16, %v4867_v8 }
 0x622   :  { %v4863_v5 = vpop.f32.mrb[6].mxu0 }
 0x623   :  { %v4876_v7 = vmul.f32 %v4863_v5, %v6609_v28  ;;  %v5741_v9 = vpop.f32.mrb[7].mxu0 }
 0x625   :  { %v4885_v10 = vadd.f32 %v4925_v6, %v4876_v7 }
 0x627   :  { %v4886_v11 = vsub.f32 0.0, %v4885_v10 }
 0x629   :  { %v4887_v12 = vmul.f32 1.442695, %v4886_v11 }
 0x62b   :  { %6070 = vpow2.f32 %v4887_v12 }
 0x635   :  { %v6071_v13 = vpop.eup %6070 }
 0x636   :  { %v4889_v14 = vadd.f32 1.0, %v6071_v13 }
 0x638   :  { %6072 = vrcp.f32 %v4889_v14 }
 0x642   :  { %v6073_v18 = vpop.eup %6072 }
 0x643   :  { %v4892_v19 = vmul.f32 %v6073_v18, %v4875_v17 }
 0x645   :  { %4894 = vst.msk [vmem:[#allocation2] sm:$0x3] %vm4893_vm6, %v4892_v19 }
 0x646   :  { %6085 = shalt.err (!%p6082_p4)
}
 0x647   :  { %s6086_s29 = scalar_lea.hbm %s6776_s7, 32 }
 0x648   :  { %p6087_p5 = scmp.ne.s32.totalorder %s6776_s7, %s6086_s29  ;;  %p6090_p6 = scmp.lt.u32.totalorder %s6086_s29, %s6776_s7 }
 0x64a   :  { %p6092_p7 = pnand %p6090_p6, %p6087_p5 }
 0x64c   :  { %6095 = shalt.err (!%p6092_p7)
}
 0x64d   :  { %4904 = dma.vmem_to_hbm [thread:$0]  %s4902_s25, 32, %s6776_s7, [#allocation3]  }
 0x64e   :  { %6096 = dma.done.wait [#allocation3], 32  }
 0x64f   :  { %6097 = vsyncadd [#allocation3], 4294967264 }
 0x650   :  { %4908 = vsyncpa [#allocation3], 1 }

</bundles_post_ra>
